<compile_context>
chip_gen: v7x
topology: tpu7x:2x2x1
jax: 0.10.0
libtpu: 0.0.40
codegen_flags: <defaults>
</compile_context>

<pallas_src>
import jax
import jax.numpy as jnp
from jax.experimental import pallas as pl
from jax.experimental.pallas import tpu as pltpu

_HP = 128  # hidden dim (3) padded to one full lane tile


def _logreg_kernel(x_ref, w1_ref, b1_ref, w2_ref, b2_ref, o_ref):
    x = x_ref[...]                                                   # [TB, F]
    # Layer 1 on the MXU; w1 is pre-padded to [F, 128] so h is lane-aligned.
    h = jnp.dot(x, w1_ref[...], preferred_element_type=jnp.float32)  # [TB, 128]
    h = jax.nn.sigmoid(h + b1_ref[...])        # padded hidden cols -> 0.5
    # Layer 2: NT contraction over the (padded) hidden lanes.
    #   w2_blk [8, 128] x h [TB, 128]^T -> [8, TB]; only row 0 carries real
    # weights (rows 1..7 and lanes >= 3 are zero, so the 0.5s contribute 0).
    # Batch lands on the lane axis -> lane-dense store.
    y = jax.lax.dot_general(
        w2_ref[...], h,
        dimension_numbers=(((1,), (1,)), ((), ())),
        preferred_element_type=jnp.float32)                          # [8, TB]
    o_ref[...] = jax.nn.sigmoid(y[0:1, :] + b2_ref[...]).astype(o_ref.dtype)


def _pick_block_b(B, F):
    """Batch tile: keep double-buffered x (2 * TB * F * 4B) under ~24 MiB so it
    fits v7x's 64 MiB VMEM (and trivially v5e/v6e's 128 MiB); cap at 1024 rows
    (per-grid-step overhead is already amortized well before that)."""
    budget = 24 * 1024 * 1024
    tb = budget // (2 * F * 4)
    tb = int(max(8, min(1024, tb)))
    if B <= tb:
        return B                         # single tile: block == full array
    return max(128, (tb // 128) * 128)   # lane-friendly multiple of 128


def logistic_regression(x, w1, b1, w2, b2, *, block_b=None):
    """x: [B, F] f32; w1: [F, 3]; b1: [1, 3]; w2: [3, 1]; b2: [1, 1].
    Returns [B, 1] f32 = sigmoid(sigmoid(x @ w1 + b1) @ w2 + b2)."""
    B, F = x.shape
    H = w1.shape[1]  # 3

    # One-time weight prep (wrapper-side, negligible): pad to MXU/lane tiles.
    w1p = jnp.zeros((F, _HP), jnp.float32).at[:, :H].set(w1.astype(jnp.float32))
    b1p = jnp.zeros((1, _HP), jnp.float32).at[:, :H].set(
        jnp.reshape(b1, (1, H)).astype(jnp.float32))
    w2p = jnp.zeros((8, _HP), jnp.float32).at[0, :H].set(
        jnp.reshape(w2, (H,)).astype(jnp.float32))
    b2p = jnp.reshape(b2, (1, 1)).astype(jnp.float32)

    # Batch tiling (pad B up to a multiple of the tile if needed).
    if block_b is None:
        block_b = _pick_block_b(B, F)
    bp = block_b * pl.cdiv(B, block_b)
    xp = x.astype(jnp.float32)
    if bp != B:
        xp = jnp.pad(xp, ((0, bp - B), (0, 0)))
    grid = (bp // block_b,)

    out_row = pl.pallas_call(
        _logreg_kernel,
        out_shape=jax.ShapeDtypeStruct((1, bp), jnp.float32),
        grid=grid,
        in_specs=[
            pl.BlockSpec((block_b, F), lambda i: (i, 0)),  # x tile (streamed)
            pl.BlockSpec((F, _HP), lambda i: (0, 0)),      # w1 (resident)
            pl.BlockSpec((1, _HP), lambda i: (0, 0)),      # b1 (resident)
            pl.BlockSpec((8, _HP), lambda i: (0, 0)),      # w2 (resident)
            pl.BlockSpec((1, 1), lambda i: (0, 0)),        # b2 (resident)
        ],
        out_specs=pl.BlockSpec((1, block_b), lambda i: (0, i)),  # lane-dense
        compiler_params=pltpu.CompilerParams(
            dimension_semantics=("parallel",),
            vmem_limit_bytes=48 * 1024 * 1024,
        ),
    )(xp, w1p, b1p, w2p, b2p)

    return out_row[0, :B].reshape(B, 1)


def init_params(key, n_input_features):
    """Deterministic init mimicking nn.Linear's U(-1/sqrt(fan_in), 1/sqrt(fan_in))."""
    k1, k2, k3, k4 = jax.random.split(key, 4)
    bound1 = 1.0 / jnp.sqrt(float(n_input_features))
    bound2 = 1.0 / jnp.sqrt(3.0)
    w1 = jax.random.uniform(k1, (n_input_features, 3), jnp.float32, -bound1, bound1)
    b1 = jax.random.uniform(k2, (1, 3), jnp.float32, -bound1, bound1)
    w2 = jax.random.uniform(k3, (3, 1), jnp.float32, -bound2, bound2)
    b2 = jax.random.uniform(k4, (1, 1), jnp.float32, -bound2, bound2)
    return w1, b1, w2, b2


def _reference(x, w1, b1, w2, b2):
    return jax.nn.sigmoid(jax.nn.sigmoid(x @ w1 + b1) @ w2 + b2)


if __name__ == "__main__":
    key = jax.random.PRNGKey(0)
    kx, kp, kx2 = jax.random.split(key, 3)

    # Small case (single tile, block == full array).
    B, F = 8, 32
    x = jax.random.normal(kx, (B, F), jnp.float32)
    w1, b1, w2, b2 = init_params(kp, F)
    out = jax.block_until_ready(logistic_regression(x, w1, b1, w2, b2))
    ref = _reference(x, w1, b1, w2, b2)
    assert out.shape == (B, 1)
    assert jnp.allclose(out, ref, atol=1e-5, rtol=1e-5)

    # Gridded + padded batch case (exercises streaming path: 200 -> pad 256,
    # grid of 2 tiles of 128 rows).
    B2 = 200
    x2 = jax.random.normal(kx2, (B2, F), jnp.float32)
    out2 = jax.block_until_ready(
        logistic_regression(x2, w1, b1, w2, b2, block_b=128))
    ref2 = _reference(x2, w1, b1, w2, b2)
    assert out2.shape == (B2, 1)
    assert jnp.allclose(out2, ref2, atol=1e-5, rtol=1e-5)

    print("KERNEL_OK")
</pallas_src>

<mosaic_0001>
module attributes {stable_mosaic.version = 11 : i64} {
  func.func @_logreg_kernel(%arg0: i32, %arg1: memref<8x32xf32, #tpu.memory_space<vmem>>, %arg2: memref<32x128xf32, #tpu.memory_space<vmem>>, %arg3: memref<1x128xf32, #tpu.memory_space<vmem>>, %arg4: memref<8x128xf32, #tpu.memory_space<vmem>>, %arg5: memref<1x1xf32, #tpu.memory_space<vmem>>, %arg6: memref<1x8xf32, #tpu.memory_space<vmem>>) attributes {dimension_semantics = [#tpu.dimension_semantics<parallel>], iteration_bounds = array<i64: 1>, scalar_prefetch = 0 : i64, scratch_operands = 0 : i64, tpu.core_type = #tpu.core_type<tc>, window_params = [{transform_indices = @transform_0, window_bounds = array<i64: 8, 32>}, {pipeline_mode = #tpu.pipeline_mode<synchronous>, transform_indices = @transform_1, window_bounds = array<i64: 32, 128>}, {pipeline_mode = #tpu.pipeline_mode<synchronous>, transform_indices = @transform_2, window_bounds = array<i64: 1, 128>}, {pipeline_mode = #tpu.pipeline_mode<synchronous>, transform_indices = @transform_3, window_bounds = array<i64: 8, 128>}, {pipeline_mode = #tpu.pipeline_mode<synchronous>, transform_indices = @transform_4, window_bounds = array<i64: 1, 1>}, {transform_indices = @transform_5, window_bounds = array<i64: 1, 8>}]} {
    %c0 = arith.constant 0 : index
    %c0_0 = arith.constant 0 : index
    %0 = vector.load %arg1[%c0, %c0_0] : memref<8x32xf32, #tpu.memory_space<vmem>>, vector<8x32xf32>
    %c0_1 = arith.constant 0 : index
    %c0_2 = arith.constant 0 : index
    %1 = vector.load %arg2[%c0_1, %c0_2] : memref<32x128xf32, #tpu.memory_space<vmem>>, vector<32x128xf32>
    %cst = arith.constant dense<0.000000e+00> : vector<8x128xf32>
    %2 = tpu.matmul %0, %1, %cst {dimension_numbers = #tpu.dot_dimension_numbers<[1], [0], [0], [1], [0, 0, 1, 1], [], []>} : vector<8x32xf32>, vector<32x128xf32>, vector<8x128xf32> -> vector<8x128xf32>
    %c0_3 = arith.constant 0 : index
    %c0_4 = arith.constant 0 : index
    %3 = vector.load %arg3[%c0_3, %c0_4] : memref<1x128xf32, #tpu.memory_space<vmem>>, vector<1x128xf32>
    %4 = vector.broadcast %3 : vector<1x128xf32> to vector<8x128xf32>
    %5 = arith.addf %2, %4 : vector<8x128xf32>
    %6 = arith.negf %5 : vector<8x128xf32>
    %7 = math.exp %6 : vector<8x128xf32>
    %cst_5 = arith.constant 1.000000e+00 : f32
    %8 = vector.broadcast %cst_5 : f32 to vector<8x128xf32>
    %9 = arith.addf %8, %7 : vector<8x128xf32>
    %10 = arith.divf %8, %9 : vector<8x128xf32>
    %c0_6 = arith.constant 0 : index
    %c0_7 = arith.constant 0 : index
    %11 = vector.load %arg4[%c0_6, %c0_7] : memref<8x128xf32, #tpu.memory_space<vmem>>, vector<8x128xf32>
    %cst_8 = arith.constant dense<0.000000e+00> : vector<8x8xf32>
    %12 = tpu.matmul %11, %10, %cst_8 {dimension_numbers = #tpu.dot_dimension_numbers<[1], [1], [0], [0], [0, 0, 1, 0], [], []>} : vector<8x128xf32>, vector<8x128xf32>, vector<8x8xf32> -> vector<8x8xf32>
    %13 = vector.extract_strided_slice %12 {offsets = [0, 0], sizes = [1, 8], strides = [1, 1]} : vector<8x8xf32> to vector<1x8xf32>
    %c0_9 = arith.constant 0 : index
    %c0_10 = arith.constant 0 : index
    %14 = vector.load %arg5[%c0_9, %c0_10] : memref<1x1xf32, #tpu.memory_space<vmem>>, vector<1x1xf32>
    %15 = vector.broadcast %14 : vector<1x1xf32> to vector<1x8xf32>
    %16 = arith.addf %13, %15 : vector<1x8xf32>
    %17 = arith.negf %16 : vector<1x8xf32>
    %18 = math.exp %17 : vector<1x8xf32>
    %cst_11 = arith.constant 1.000000e+00 : f32
    %19 = vector.broadcast %cst_11 : f32 to vector<1x8xf32>
    %20 = arith.addf %19, %18 : vector<1x8xf32>
    %21 = arith.divf %19, %20 : vector<1x8xf32>
    %c0_12 = arith.constant 0 : index
    %c0_13 = arith.constant 0 : index
    %22 = vector.load %arg6[%c0_12, %c0_13] : memref<1x8xf32, #tpu.memory_space<vmem>>, vector<1x8xf32>
    tpu.vector_store %arg6[%c0_12, %c0_13], %21 {strides = array<i32>} : memref<1x8xf32, #tpu.memory_space<vmem>>, vector<1x8xf32>,
    return
  }
  func.func @transform_0(%arg0: i32) -> (i32, i32) {
    %c0_i32 = arith.constant 0 : i32
    %c0_i32_0 = arith.constant 0 : i32
    return %arg0, %c0_i32 : i32, i32
  }
  func.func @transform_1(%arg0: i32) -> (i32, i32) {
    %c0_i32 = arith.constant 0 : i32
    %c0_i32_0 = arith.constant 0 : i32
    %c0_i32_1 = arith.constant 0 : i32
    return %c0_i32, %c0_i32_0 : i32, i32
  }
  func.func @transform_2(%arg0: i32) -> (i32, i32) {
    %c0_i32 = arith.constant 0 : i32
    %c0_i32_0 = arith.constant 0 : i32
    %c0_i32_1 = arith.constant 0 : i32
    return %c0_i32, %c0_i32_0 : i32, i32
  }
  func.func @transform_3(%arg0: i32) -> (i32, i32) {
    %c0_i32 = arith.constant 0 : i32
    %c0_i32_0 = arith.constant 0 : i32
    %c0_i32_1 = arith.constant 0 : i32
    return %c0_i32, %c0_i32_0 : i32, i32
  }
  func.func @transform_4(%arg0: i32) -> (i32, i32) {
    %c0_i32 = arith.constant 0 : i32
    %c0_i32_0 = arith.constant 0 : i32
    %c0_i32_1 = arith.constant 0 : i32
    return %c0_i32, %c0_i32_0 : i32, i32
  }
  func.func @transform_5(%arg0: i32) -> (i32, i32) {
    %c0_i32 = arith.constant 0 : i32
    %c0_i32_0 = arith.constant 0 : i32
    return %c0_i32, %arg0 : i32, i32
  }
}

</mosaic_0001>

<bundles_post_ra>
// kernel: tpu_custom_call.1
= control target key start
LH: loop header
LB: loop body
LE: loop exit
PB: predicated region body
PF: predicated region fallthrough
CT: control target
= control target key end

     0   :  { %s461_s0 = inlined_call_operand.hbm [shape: f32[8,32], index: 0, kind: input, shape index: {}]   ;;  %s462_s1 = inlined_call_operand.hbm [shape: f32[32,128], index: 1, kind: input, shape index: {}]   ;;  %s463_s2 = inlined_call_operand.vmem [shape: f32[1,128], index: 2, kind: input, shape index: {}]   ;;  %s464_s3 = inlined_call_operand.vmem [shape: f32[8,128], index: 3, kind: input, shape index: {}]   ;;  %s465_s4 = inlined_call_operand.<no memory space> [shape: f32[1,1], index: 4, kind: input, shape index: {}]   ;;  %s466_s5 = inlined_call_operand.hbm [shape: f32[1,8], index: 5, kind: output, shape index: {}]  }
   0x1   :  { %v10_v0 = vstv %s465_s4 }
   0x2   :  { %11 = vst [vmem:[#allocation2] sm:$0x1] %v10_v0 }
   0x3   :  { %12 = vsyncpa [#allocation4], 0 }
   0x4   :  { %13 = vsyncpa [#allocation7], 0 }
   0x5   :  { %14 = vsyncpa [#allocation5], 0  ;;  %s370_s20 = smov [#allocation3]   ;;  %s371_s22 = smov [#allocation6]  }
   0x6   :  { %s21_s21 = sshll.u32 %s370_s20, 4  ;;  %s30_s23 = sshll.u32 %s371_s22, 4  ;;  %s22_s21 = int_to_ptr.vmem [resolvable:$true] %s21_s21  ;;  %s412_s23 = int_to_ptr.vmem [resolvable:$true] %s30_s23 }
   0x7   :  { %s298_s26 = scalar_lea.hbm %s461_s0, 128 }
   0x8   :  { %p299_p0 = scmp.ne.s32.totalorder %s461_s0, %s298_s26  ;;  %p302_p1 = scmp.lt.u32.totalorder %s298_s26, %s461_s0 }
   0xa   :  { %p304_p2 = pnand %p302_p1, %p299_p0 }
   0xc   :  { %307 = shalt.err (!%p304_p2)
}
   0xd   :  { %s308_s30 = scalar_lea.vmem %s22_s21, 128  ;;  %p313_p4 = scmp.lt.s32.totalorder %s22_s21, %s22_s21 }
   0xe   :  { %p309_p3 = scmp.ne.s32.totalorder %s22_s21, %s308_s30  ;;  %p314_p5 = scmp.lt.s32.totalorder %s308_s30, %s308_s30 }
  0x10   :  { %p315_p6 = por %p314_p5, %p313_p4 }
  0x12   :  { %p316_p7 = pnand %p315_p6, %p309_p3 }
  0x14   :  { %319 = shalt.err (!%p316_p7)
}
  0x15   :  { %24 = dma.hbm_to_vmem [thread:$0]  %s461_s0, 128, %s22_s21, [#allocation4]  }
  0x16   :  { %s320_s10 = scalar_lea.hbm %s462_s1, 512 }
  0x17   :  { %p321_p8 = scmp.ne.s32.totalorder %s462_s1, %s320_s10  ;;  %p324_p9 = scmp.lt.u32.totalorder %s320_s10, %s462_s1 }
  0x19   :  { %p326_p10 = pnand %p324_p9, %p321_p8 }
  0x1b   :  { %329 = shalt.err (!%p326_p10)
}
  0x1c   :  { %s330_s15 = scalar_lea.vmem %s412_s23, 512  ;;  %p335_p12 = scmp.lt.s32.totalorder %s412_s23, %s412_s23 }
  0x1d   :  { %p331_p11 = scmp.ne.s32.totalorder %s412_s23, %s330_s15  ;;  %p336_p13 = scmp.lt.s32.totalorder %s330_s15, %s330_s15 }
  0x1f   :  { %p337_p0 = por %p336_p13, %p335_p12 }
  0x21   :  { %p338_p1 = pnand %p337_p0, %p331_p11 }
  0x23   :  { %341 = shalt.err (!%p338_p1)
}
  0x24   :  { %s372_s0 = smov 128   ;;  %s373_s16 = smov 8  }
  0x25   :  { %36 = dma.hbm_to_vmem [thread:$0]  %s462_s1, 512, %s412_s23, [#allocation7], %s372_s0, %s372_s0, %s373_s16  }
  0x26   :  { %364 = dma.done.wait [#allocation4], 128  }
  0x27   :  { %365 = vsyncadd [#allocation4], 4294967168 }
  0x28   :  { %366 = dma.done.wait [#allocation7], 512  }
  0x29   :  { %367 = vsyncadd [#allocation7], 4294966784  ;;  %v374_v1 = vmov 0.0|0.0   ;;  %vm375_vm0 = vmmov 0   ;;  %v376_v2 = vmov 0.0   ;;  %v50_v3 = vld [vmem:[#allocation6] sm:$0xff]  ;;  %v218_v21 = vlaneseq }
  0x2a   :  { %274 = vmatprep.subr.bf16.mxu0 %v374_v1  ;;  %266 = vmatprep.mubr.msk.f32.mxu0 %vm375_vm0, %v376_v2  ;;  %v51_v4 = vld [vmem:[#allocation6 + $0x8] sm:$0xff]  ;;  %v52_v5 = vld [vmem:[#allocation6 + $0x10] sm:$0xff]  ;;  %v53_v7 = vld [vmem:[#allocation6 + $0x18] sm:$0xff]  ;;  %vm61_vm1 = vcmask 261120   ;;  %v377_v11 = vmov 0   ;;  %vm229_vm2 = vcmask 57344  }
  0x2b   :  { %269 = vmatprep.subr.mxu1 %v376_v2  ;;  %271 = vmatprep.mubr.msk.f32.mxu1 %vm375_vm0, %v376_v2  ;;  %v275_v6 = vpack.c.bf16 %v51_v4, %v50_v3  ;;  %v278_v8 = vpack.c.bf16 %v53_v7, %v52_v5  ;;  %v49_v9 = vld [vmem:[#allocation3] sm:$0xff]  ;;  %v212_v10 = vld [vmem:[#allocation2] sm:$0x1]  ;;  %v219_v22 = vshrl.u32 %v218_v21, 7 }
  0x2c   :  { %289 = vset.pattern.permute.xlu0 %v377_v11  ;;  %v247_v12 = vld [vmem:[%s463_s2] ss:$0 sm:$0xff]  ;;  %s378_s2 = smov [#allocation8]  }
  0x2d   :  { %276 = vmatpush3.bf16.msra.mxu0 %v275_v6  ;;  %215 = vperm.xlu0 %289, %v212_v10   ;;  %v141_v20 = vld [vmem:[%s464_s3] sm:$0xff]  ;;  %v220_v23 = vsub.s32 0, %v219_v22  ;;  %s237_s22 = sshll.u32 %s378_s2, 4  ;;  %s238_s22 = int_to_ptr.vmem [resolvable:$true] %s237_s22 }
  0x2e   :  { %277 = vmatprep.subr.bf16.mxu0 %v374_v1  ;;  %s342_s3 = scalar_lea.vmem %s238_s22, 16  ;;  %s346_s23 = scalar_lea.vmem %s238_s22, 32 }
  0x2f   :  { %p343_p2 = scmp.ne.s32.totalorder %s238_s22, %s342_s3  ;;  %p347_p3 = scmp.lt.s32.totalorder %s238_s22, %s238_s22 }
  0x30   :  { %p348_p4 = scmp.lt.s32.totalorder %s346_s23, %s342_s3 }
  0x31   :  { %279 = vmatpush3.bf16.msra.mxu0 %v278_v8 }
  0x32   :  { %p349_p5 = por %p348_p4, %p347_p3 }
  0x34   :  { %267 = vmatmul.mubr.msk.f32.vlgmr.msra.gmra.mrb[0].mxu0 %vm61_vm1, %v49_v9  ;;  %p350_p6 = pnand %p349_p5, %p343_p2 }
  0xac   :  { %v216_v24 = vpop.permute.xlu0 %215 }
  0xad   :  { %v221_v25 = vrot.slane %v216_v24, %v220_v23 }
 0x107   :  { %v131_v13 = vpop.f32.mrb[0].mxu0 }
 0x108   :  { %v132_v14 = vadd.f32 %v247_v12, %v131_v13  ;;  %v268_v15 = vpop.f32.mrb[1].mxu0 }
 0x10a   :  { %v249_v16 = vmul.f32 -1.442695, %v132_v14 }
 0x10c   :  { %290 = vpow2.f32 %v249_v16 }
 0x116   :  { %v291_v17 = vpop.eup %290 }
 0x117   :  { %v138_v18 = vadd.f32 1.0, %v291_v17 }
 0x119   :  { %292 = vrcp.f32 %v138_v18 }
 0x123   :  { %v293_v19 = vpop.eup %292 }
 0x124   :  { %270 = vmatpush3.xpose.msra.mxu1 %v293_v19 }
 0x127   :  { %272 = vmatmul.mubr.f32.vlgmr.msra.gmra.mrb[0].mxu1 %v141_v20 }
 0x1fa   :  { %v208_v26 = vpop.f32.mrb[0].mxu1 }
 0x1fb   :  { %v222_v27 = vadd.f32 %v221_v25, %v208_v26  ;;  %v273_v28 = vpop.f32.mrb[1].mxu1 }
 0x1fd   :  { %v250_v29 = vmul.f32 -1.442695, %v222_v27 }
 0x1ff   :  { %294 = vpow2.f32 %v250_v29 }
 0x209   :  { %v295_v30 = vpop.eup %294 }
 0x20a   :  { %v226_v31 = vadd.f32 1.0, %v295_v30 }
 0x20c   :  { %296 = vrcp.f32 %v226_v31 }
 0x216   :  { %v297_v32 = vpop.eup %296 }
 0x217   :  { %230 = vst.msk [vmem:[#allocation8] sm:$0x1] %vm229_vm2, %v297_v32 }
 0x218   :  { %353 = shalt.err (!%p350_p6)
}
 0x219   :  { %s354_s26 = scalar_lea.hbm %s466_s5, 16 }
 0x21a   :  { %p355_p7 = scmp.ne.s32.totalorder %s466_s5, %s354_s26  ;;  %p358_p8 = scmp.lt.u32.totalorder %s354_s26, %s466_s5 }
 0x21c   :  { %p360_p9 = pnand %p358_p8, %p355_p7 }
 0x21e   :  { %363 = shalt.err (!%p360_p9)
}
 0x21f   :  { %240 = dma.vmem_to_hbm [thread:$0]  %s238_s22, 16, %s466_s5, [#allocation5]  }
 0x220   :  { %368 = dma.done.wait [#allocation5], 16  }
 0x221   :  { %369 = vsyncadd [#allocation5], 4294967280 }
 0x222   :  { %244 = vsyncpa [#allocation4], 1 }
 0x223   :  { %245 = vsyncpa [#allocation7], 1 }
 0x224   :  { %246 = vsyncpa [#allocation5], 1 }

</bundles_post_ra>
